<compile_context>
chip_gen: v7x
topology: tpu7x:2x2x1
jax: 0.10.0
libtpu: 0.0.40
codegen_flags: <defaults>
</compile_context>

<pallas_src>
import functools

import jax
import jax.numpy as jnp
from jax.experimental import pallas as pl
from jax.experimental.pallas import tpu as pltpu


# ---------------------------------------------------------------------------
# Hardware-aware tiling helpers
# ---------------------------------------------------------------------------
def _vmem_capacity_bytes():
    try:
        return int(pltpu.get_tpu_info().vmem_capacity_bytes)
    except Exception:
        return 128 * 1024 * 1024            # v5e/v6e default if query unavailable


_VMEM_CAP = _vmem_capacity_bytes()
_VMEM_LIMIT_BYTES = min(_VMEM_CAP // 2, 64 * 1024 * 1024)   # scoped-VMEM limit
_VMEM_TILE_BUDGET = _VMEM_LIMIT_BYTES // 2                  # pipeline working budget
_MAX_ROW_TILE = 2048

_ON_TPU = jax.default_backend() == "tpu"


def _cdiv(a, b):
    return -(-a // b)


def _round_up(x, m):
    return ((x + m - 1) // m) * m


def _pick_row_tile(n_rows, per_row_bytes, fixed_bytes=0):
    """Largest multiple-of-8 row tile whose working set fits the VMEM budget,
    capped so the row grid has >= 2 steps (keeps both v7x TCs occupied)."""
    if n_rows < 8:
        return n_rows                        # block == full (tiny) array extent
    budget = max(_VMEM_TILE_BUDGET - fixed_bytes, 1 << 20)
    tr = budget // max(per_row_bytes, 1)
    tr = max(8, min(_MAX_ROW_TILE, (tr // 8) * 8))
    tr = min(tr, _round_up(_cdiv(n_rows, 2), 8))
    return max(tr, 8)


def _dropout_threshold(p):
    # drop  <=>  bits < threshold, with P(bits < threshold) ~= p
    return min(int(round(p * (2 ** 32))), 2 ** 32 - 1)


def _seed_from_key(key):
    if key is None:
        key = jax.random.PRNGKey(0)
    return jax.random.randint(key, (1,), 0, jnp.iinfo(jnp.int32).max,
                              dtype=jnp.int32)


def _compiler_params():
    return pltpu.CompilerParams(dimension_semantics=("parallel",),
                                vmem_limit_bytes=_VMEM_LIMIT_BYTES)


# ---------------------------------------------------------------------------
# Kernel 1: standalone LayerNormalization  (alpha * (x - mean) / (std + eps) + beta)
# (used by the generic path, where the sublayer is an arbitrary callable)
# ---------------------------------------------------------------------------
def _layernorm_kernel(x_ref, alpha_ref, beta_ref, o_ref, *, eps):
    x = x_ref[...].astype(jnp.float32)                         # (tr, F)
    f = x.shape[-1]
    mean = jnp.mean(x, axis=-1, keepdims=True)
    diff = x - mean
    var = jnp.sum(diff * diff, axis=-1, keepdims=True) * (1.0 / max(f - 1, 1))
    inv = pl.reciprocal(jnp.sqrt(var) + eps)                   # per-row, EUP slot
    y = diff * inv * alpha_ref[...].astype(jnp.float32) \
        + beta_ref[...].astype(jnp.float32)
    o_ref[...] = y.astype(o_ref.dtype)


def layernorm_pallas(x2d, alpha, beta, eps):
    R, F = x2d.shape
    tr = _pick_row_tile(R, per_row_bytes=F * 4 * 2 * 2)        # x + out, double-buffered
    row = pl.BlockSpec((tr, F), lambda i: (i, 0))
    vec = pl.BlockSpec((1, F), lambda i: (0, 0))
    return pl.pallas_call(
        functools.partial(_layernorm_kernel, eps=eps),
        out_shape=jax.ShapeDtypeStruct((R, F), x2d.dtype),
        grid=(_cdiv(R, tr),),
        in_specs=[row, vec, vec],
        out_specs=row,
        compiler_params=_compiler_params(),
    )(x2d, alpha.reshape(1, F), beta.reshape(1, F))


# ---------------------------------------------------------------------------
# Kernel 2: residual add + inverted dropout   out = x + dropout(y)
# (generic path; dropout bits from the in-kernel TPU PRNG, seeded via scalar
#  prefetch + program_id; host-bits fallback for non-TPU backends)
# ---------------------------------------------------------------------------
def _make_resid_dropout_add_kernel(use_dropout, host_bits, threshold, scale):
    def kernel(seed_ref, x_ref, y_ref, *rest):
        if use_dropout and host_bits:
            bits_ref, o_ref = rest
        else:
            (o_ref,) = rest
        y = y_ref[...].astype(jnp.float32)
        if use_dropout:
            if host_bits:
                bits = bits_ref[...]
            else:
                pltpu.prng_seed(seed_ref[0] + pl.program_id(0))
                bits = pltpu.bitcast(pltpu.prng_random_bits(y.shape), jnp.uint32)
            keep = bits >= jnp.uint32(threshold)               # single uint32 compare
            y = jnp.where(keep, y * jnp.float32(scale), 0.0)
        o_ref[...] = (x_ref[...].astype(jnp.float32) + y).astype(o_ref.dtype)
    return kernel


def residual_dropout_add_pallas(x2d, y2d, *, dropout_p, training, key=None):
    R, F = x2d.shape
    use_dropout = bool(training) and dropout_p > 0.0
    if use_dropout and dropout_p >= 1.0:
        return x2d                                             # dropout zeroes sublayer output

    # Elementwise op: view as a wider lane-dense slab to cut store count.
    g = 1
    for cand in (8, 4, 2):
        if R % cand == 0 and R // cand >= 8 and F * cand <= 8192:
            g = cand
            break
    Rw, Fw = R // g, F * g
    xw = x2d.reshape(Rw, Fw)
    yw = y2d.reshape(Rw, Fw)

    host_bits = use_dropout and not _ON_TPU
    n_stream = 3 + (1 if host_bits else 0)                     # x, y, out (+ bits)
    tr = _pick_row_tile(Rw, per_row_bytes=Fw * 4 * 2 * n_stream)

    threshold = _dropout_threshold(dropout_p) if use_dropout else 0
    scale = 1.0 / (1.0 - dropout_p) if use_dropout else 1.0
    seed = _seed_from_key(key) if use_dropout else jnp.zeros((1,), jnp.int32)

    row = pl.BlockSpec((tr, Fw), lambda i, s: (i, 0))
    in_specs = [row, row]
    args = [xw, yw]
    if host_bits:
        in_specs.append(row)
        args.append(jax.random.bits(key, (Rw, Fw), dtype=jnp.uint32))

    out = pl.pallas_call(
        _make_resid_dropout_add_kernel(use_dropout, host_bits, threshold, scale),
        out_shape=jax.ShapeDtypeStruct((Rw, Fw), x2d.dtype),
        grid_spec=pltpu.PrefetchScalarGridSpec(
            num_scalar_prefetch=1,
            grid=(_cdiv(Rw, tr),),
            in_specs=in_specs,
            out_specs=row),
        compiler_params=_compiler_params(),
    )(seed, *args)
    return out.reshape(R, F)


# ---------------------------------------------------------------------------
# Kernel 3 (fully fused fast path for a Linear(F, F) sublayer):
#   out = x + dropout(LayerNorm(x) @ W + b)
# Single K step (full feature row resident for LN anyway) -> no scratch
# accumulator, no pl.when; dropout + residual fused into the epilogue.
# ---------------------------------------------------------------------------
def _make_fused_kernel(*, eps, use_dropout, host_bits, threshold, scale, mxu_dtype):
    def kernel(seed_ref, x_ref, w_ref, b_ref, alpha_ref, beta_ref, *rest):
        if use_dropout and host_bits:
            bits_ref, o_ref = rest
        else:
            (o_ref,) = rest
        x = x_ref[...].astype(jnp.float32)                     # (tm, F)
        f = x.shape[-1]
        mean = jnp.mean(x, axis=-1, keepdims=True)
        diff = x - mean
        var = jnp.sum(diff * diff, axis=-1, keepdims=True) * (1.0 / max(f - 1, 1))
        inv = pl.reciprocal(jnp.sqrt(var) + eps)
        normed = diff * inv * alpha_ref[...].astype(jnp.float32) \
            + beta_ref[...].astype(jnp.float32)
        y = jnp.dot(normed.astype(mxu_dtype), w_ref[...].astype(mxu_dtype),
                    preferred_element_type=jnp.float32)
        y = y + b_ref[...].astype(jnp.float32)
        if use_dropout:
            if host_bits:
                bits = bits_ref[...]
            else:
                pltpu.prng_seed(seed_ref[0] + pl.program_id(0))
                bits = pltpu.bitcast(pltpu.prng_random_bits(y.shape), jnp.uint32)
            keep = bits >= jnp.uint32(threshold)
            y = jnp.where(keep, y * jnp.float32(scale), 0.0)
        o_ref[...] = (x + y).astype(o_ref.dtype)
    return kernel


def fused_ln_linear_dropout_residual_pallas(x2d, W, b, alpha, beta, *, eps,
                                            dropout_p, training, key=None,
                                            matmul_dtype=None):
    R, F = x2d.shape
    assert W.shape == (F, F), "residual connection requires Linear(F -> F)"
    use_dropout = bool(training) and dropout_p > 0.0
    if use_dropout and dropout_p >= 1.0:
        return x2d

    mxu_dtype = jnp.dtype(matmul_dtype) if matmul_dtype is not None else x2d.dtype
    w_arg = W.astype(mxu_dtype) if matmul_dtype is not None else W

    host_bits = use_dropout and not _ON_TPU
    w_bytes = 2 * F * F * jnp.dtype(w_arg.dtype).itemsize      # resident W (buffered)
    small_bytes = 3 * F * 4 * 2                                # b / alpha / beta
    n_stream = 2 + (1 if host_bits else 0)                     # x, out (+ bits)
    tm = _pick_row_tile(R, per_row_bytes=F * 4 * 2 * n_stream,
                        fixed_bytes=w_bytes + small_bytes)

    threshold = _dropout_threshold(dropout_p) if use_dropout else 0
    scale = 1.0 / (1.0 - dropout_p) if use_dropout else 1.0
    seed = _seed_from_key(key) if use_dropout else jnp.zeros((1,), jnp.int32)

    row = pl.BlockSpec((tm, F), lambda i, s: (i, 0))
    vec = pl.BlockSpec((1, F), lambda i, s: (0, 0))
    in_specs = [row,
                pl.BlockSpec((F, F), lambda i, s: (0, 0)),     # W stays VMEM-resident
                vec, vec, vec]
    args = [x2d, w_arg, b.reshape(1, F), alpha.reshape(1, F), beta.reshape(1, F)]
    if host_bits:
        in_specs.append(row)
        args.append(jax.random.bits(key, (R, F), dtype=jnp.uint32))

    return pl.pallas_call(
        _make_fused_kernel(eps=eps, use_dropout=use_dropout, host_bits=host_bits,
                           threshold=threshold, scale=scale, mxu_dtype=mxu_dtype),
        out_shape=jax.ShapeDtypeStruct((R, F), x2d.dtype),
        grid_spec=pltpu.PrefetchScalarGridSpec(
            num_scalar_prefetch=1,
            grid=(_cdiv(R, tm),),
            in_specs=in_specs,
            out_specs=row),
        compiler_params=_compiler_params(),
    )(seed, *args)


# ---------------------------------------------------------------------------
# ResidualConnection forward
# ---------------------------------------------------------------------------
def residual_connection_forward(x, sublayer, alpha, beta, *, dropout_p,
                                eps=1e-6, training=False, key=None):
    """Generic path: sublayer is an arbitrary callable (runs as plain JAX
    between the LayerNorm kernel and the dropout+residual kernel)."""
    B, S, F = x.shape
    x2d = x.reshape(B * S, F)
    normed = layernorm_pallas(x2d, alpha, beta, eps)
    sub_out = sublayer(normed.reshape(B, S, F)).reshape(B * S, F)
    out = residual_dropout_add_pallas(x2d, sub_out, dropout_p=dropout_p,
                                      training=training, key=key)
    return out.reshape(B, S, F)


def residual_connection_forward_fused_linear(x, W, b, alpha, beta, *, dropout_p,
                                             eps=1e-6, training=False, key=None,
                                             matmul_dtype=None):
    """Fast path when the sublayer is Linear(F, F): LayerNorm + matmul + bias +
    dropout + residual add fused in a single pallas_call."""
    B, S, F = x.shape
    x2d = x.reshape(B * S, F)
    w_itemsize = (jnp.dtype(matmul_dtype).itemsize if matmul_dtype is not None
                  else jnp.dtype(W.dtype).itemsize)
    if 2 * F * F * w_itemsize > _VMEM_TILE_BUDGET // 2:
        # TODO(synk): add a K/N-tiled fused variant for very large F instead of
        # falling back to the unfused generic path.
        sublayer = lambda t: jnp.dot(t, W) + b
        return residual_connection_forward(x, sublayer, alpha, beta,
                                           dropout_p=dropout_p, eps=eps,
                                           training=training, key=key)
    out = fused_ln_linear_dropout_residual_pallas(
        x2d, W, b, alpha, beta, eps=eps, dropout_p=dropout_p,
        training=training, key=key, matmul_dtype=matmul_dtype)
    return out.reshape(B, S, F)


# ---------------------------------------------------------------------------
# Pure-JAX reference (eval mode) for correctness checks
# ---------------------------------------------------------------------------
def _ref_layernorm(x, alpha, beta, eps):
    mean = jnp.mean(x, axis=-1, keepdims=True)
    diff = x - mean
    var = jnp.sum(diff * diff, axis=-1, keepdims=True) / (x.shape[-1] - 1)
    return alpha * diff / (jnp.sqrt(var) + eps) + beta


if __name__ == "__main__":
    B, S, F = 2, 8, 128
    dropout_p = 0.1
    eps = 1e-6

    key = jax.random.PRNGKey(0)
    kx, kw, kb, kdrop = jax.random.split(key, 4)

    x = jax.random.normal(kx, (B, S, F), dtype=jnp.float32)

    # LayerNormalization parameters (torch init: ones / zeros)
    alpha = jnp.ones((F,), dtype=jnp.float32)
    beta = jnp.zeros((F,), dtype=jnp.float32)

    # Deterministic sublayer: a simple Linear(F, F)
    W = jax.random.normal(kw, (F, F), dtype=jnp.float32) * 0.02
    b = jax.random.normal(kb, (F,), dtype=jnp.float32) * 0.02
    sublayer = lambda t: jnp.dot(t, W) + b

    ref = x + sublayer(_ref_layernorm(x, alpha, beta, eps))

    # 1) Generic path, eval mode (dropout = identity).
    out_eval = residual_connection_forward(
        x, sublayer, alpha, beta, dropout_p=dropout_p, eps=eps, training=False)
    jax.block_until_ready(out_eval)
    assert jnp.allclose(out_eval, ref, atol=1e-4, rtol=1e-4), "generic eval mismatch"

    # 2) Fully fused LN + Linear path, eval mode.
    out_fused = residual_connection_forward_fused_linear(
        x, W, b, alpha, beta, dropout_p=dropout_p, eps=eps, training=False)
    jax.block_until_ready(out_fused)
    assert jnp.allclose(out_fused, ref, atol=1e-4, rtol=1e-4), "fused eval mismatch"

    # 3) Training mode with p = 0 must be deterministic and match the reference.
    out_train0 = residual_connection_forward(
        x, sublayer, alpha, beta, dropout_p=0.0, eps=eps, training=True, key=kdrop)
    jax.block_until_ready(out_train0)
    assert jnp.allclose(out_train0, ref, atol=1e-4, rtol=1e-4), "p=0 training mismatch"

    # 4) Training mode with dropout — outputs finite and the dropped fraction
    #    (positions where out == x exactly, because dropped sublayer terms are 0)
    #    lands near p.
    out_train = residual_connection_forward(
        x, sublayer, alpha, beta, dropout_p=dropout_p, eps=eps,
        training=True, key=kdrop)
    out_train_fused = residual_connection_forward_fused_linear(
        x, W, b, alpha, beta, dropout_p=dropout_p, eps=eps,
        training=True, key=kdrop)
    jax.block_until_ready((out_train, out_train_fused))
    assert bool(jnp.all(jnp.isfinite(out_train)))
    assert bool(jnp.all(jnp.isfinite(out_train_fused)))
    frac_g = float(jnp.mean((out_train == x).astype(jnp.float32)))
    frac_f = float(jnp.mean((out_train_fused == x).astype(jnp.float32)))
    assert abs(frac_g - dropout_p) < 0.08, f"generic dropout fraction {frac_g}"
    assert abs(frac_f - dropout_p) < 0.08, f"fused dropout fraction {frac_f}"

    print("KERNEL_OK")
</pallas_src>

<mosaic_0001>
module attributes {stable_mosaic.version = 11 : i64} {
  func.func @_layernorm_kernel(%arg0: i32, %arg1: memref<8x128xf32, #tpu.memory_space<vmem>>, %arg2: memref<1x128xf32, #tpu.memory_space<vmem>>, %arg3: memref<1x128xf32, #tpu.memory_space<vmem>>, %arg4: memref<8x128xf32, #tpu.memory_space<vmem>>) attributes {dimension_semantics = [#tpu.dimension_semantics<parallel>], iteration_bounds = array<i64: 2>, scalar_prefetch = 0 : i64, scratch_operands = 0 : i64, tpu.core_type = #tpu.core_type<tc>, window_params = [{transform_indices = @transform_0, window_bounds = array<i64: 8, 128>}, {pipeline_mode = #tpu.pipeline_mode<synchronous>, transform_indices = @transform_1, window_bounds = array<i64: 1, 128>}, {pipeline_mode = #tpu.pipeline_mode<synchronous>, transform_indices = @transform_2, window_bounds = array<i64: 1, 128>}, {transform_indices = @transform_3, window_bounds = array<i64: 8, 128>}]} {
    %c0 = arith.constant 0 : index
    %c0_0 = arith.constant 0 : index
    %0 = vector.load %arg1[%c0, %c0_0] : memref<8x128xf32, #tpu.memory_space<vmem>>, vector<8x128xf32>
    %cst = arith.constant dense<0.000000e+00> : vector<8xf32>
    %1 = vector.multi_reduction <add>, %0, %cst [1] : vector<8x128xf32> to vector<8xf32>
    %2 = vector.shape_cast %1 : vector<8xf32> to vector<8x1xf32>
    %cst_1 = arith.constant 1.280000e+02 : f32
    %3 = vector.broadcast %cst_1 : f32 to vector<8x1xf32>
    %4 = arith.divf %2, %3 : vector<8x1xf32>
    %5 = vector.broadcast %4 : vector<8x1xf32> to vector<8x128xf32>
    %6 = arith.subf %0, %5 : vector<8x128xf32>
    %7 = arith.mulf %6, %6 : vector<8x128xf32>
    %cst_2 = arith.constant dense<0.000000e+00> : vector<8xf32>
    %8 = vector.multi_reduction <add>, %7, %cst_2 [1] : vector<8x128xf32> to vector<8xf32>
    %9 = vector.shape_cast %8 : vector<8xf32> to vector<8x1xf32>
    %cst_3 = arith.constant 0.00787401571 : f32
    %10 = vector.broadcast %cst_3 : f32 to vector<8x1xf32>
    %11 = arith.mulf %9, %10 : vector<8x1xf32>
    %12 = math.sqrt %11 : vector<8x1xf32>
    %cst_4 = arith.constant 9.99999997E-7 : f32
    %13 = vector.broadcast %cst_4 : f32 to vector<8x1xf32>
    %14 = arith.addf %12, %13 : vector<8x1xf32>
    %15 = tpu.reciprocal %14 : vector<8x1xf32> -> vector<8x1xf32>
    %16 = vector.broadcast %15 : vector<8x1xf32> to vector<8x128xf32>
    %17 = arith.mulf %6, %16 : vector<8x128xf32>
    %c0_5 = arith.constant 0 : index
    %c0_6 = arith.constant 0 : index
    %18 = vector.load %arg2[%c0_5, %c0_6] : memref<1x128xf32, #tpu.memory_space<vmem>>, vector<1x128xf32>
    %19 = vector.broadcast %18 : vector<1x128xf32> to vector<8x128xf32>
    %20 = arith.mulf %17, %19 : vector<8x128xf32>
    %c0_7 = arith.constant 0 : index
    %c0_8 = arith.constant 0 : index
    %21 = vector.load %arg3[%c0_7, %c0_8] : memref<1x128xf32, #tpu.memory_space<vmem>>, vector<1x128xf32>
    %22 = vector.broadcast %21 : vector<1x128xf32> to vector<8x128xf32>
    %23 = arith.addf %20, %22 : vector<8x128xf32>
    %c0_9 = arith.constant 0 : index
    %c0_10 = arith.constant 0 : index
    %24 = vector.load %arg4[%c0_9, %c0_10] : memref<8x128xf32, #tpu.memory_space<vmem>>, vector<8x128xf32>
    tpu.vector_store %arg4[%c0_9, %c0_10], %23 {strides = array<i32>} : memref<8x128xf32, #tpu.memory_space<vmem>>, vector<8x128xf32>,
    return
  }
  func.func @transform_0(%arg0: i32) -> (i32, i32) {
    %c0_i32 = arith.constant 0 : i32
    %c0_i32_0 = arith.constant 0 : i32
    return %arg0, %c0_i32 : i32, i32
  }
  func.func @transform_1(%arg0: i32) -> (i32, i32) {
    %c0_i32 = arith.constant 0 : i32
    %c0_i32_0 = arith.constant 0 : i32
    %c0_i32_1 = arith.constant 0 : i32
    return %c0_i32, %c0_i32_0 : i32, i32
  }
  func.func @transform_2(%arg0: i32) -> (i32, i32) {
    %c0_i32 = arith.constant 0 : i32
    %c0_i32_0 = arith.constant 0 : i32
    %c0_i32_1 = arith.constant 0 : i32
    return %c0_i32, %c0_i32_0 : i32, i32
  }
  func.func @transform_3(%arg0: i32) -> (i32, i32) {
    %c0_i32 = arith.constant 0 : i32
    %c0_i32_0 = arith.constant 0 : i32
    return %arg0, %c0_i32 : i32, i32
  }
}

</mosaic_0001>

<bundles_post_ra>
// kernel: tpu_custom_call.1
= control target key start
LH: loop header
LB: loop body
LE: loop exit
PB: predicated region body
PF: predicated region fallthrough
CT: control target
= control target key end

     0   :  { %8 = vsyncpa [#allocation3], 0  ;;  %s852_s0 = inlined_call_operand.hbm [shape: f32[16,128], index: 0, kind: input, shape index: {}]   ;;  %s853_s1 = inlined_call_operand.hbm [shape: f32[1,128], index: 1, kind: input, shape index: {}]   ;;  %s854_s2 = inlined_call_operand.hbm [shape: f32[1,128], index: 2, kind: input, shape index: {}]   ;;  %s855_s3 = inlined_call_operand.hbm [shape: f32[16,128], index: 3, kind: output, shape index: {}]  }
   0x1   :  { %10 = vsyncpa [#allocation3 + $0x1], 0 }
   0x2   :  { %11 = vsyncpa [#allocation6], 0 }
   0x3   :  { %12 = vsyncpa [#allocation4], 0 }
   0x4   :  { %14 = vsyncpa [#allocation4 + $0x1], 0  ;;  %s622_s12 = smov 0   ;;  %s624_s13 = smov 0  }
   0x5   :  { %s626_s14 = smov 0   ;;  %s628_s15 = smov 0  }
   0x6 LB: > { %s643_s16 = sadd.s32 4294967295, %s596_s15   ;;  %s351_s17 = sadd.s32 4294967294, %s596_s15   ;;  %s596_s15 = sphi %s628_s15, %s875_s15   ;;  %s592_s14 = sphi %s626_s14, %s874_s14   ;;  %s588_s13 = sphi %s624_s13, %s873_s13   ;;  %s584_s12 = sphi %s622_s12, %s872_s12  }
   0x7   : > { %p40_p0 = scmp.ne.s32.totalorder %s588_s13, %s584_s12  ;;  %p856_p1 = scmp.eq.s32.totalorder %s643_s16, 0 }
   0x8   : > { %p112_p3 = scmp.eq.s32.totalorder %s351_s17, 1  ;;  %p352_p5 = scmp.ge.s32.totalorder %s596_s15, 1 }
   0x9   : > { %p652_p4 = por %p856_p1, %p40_p0  ;;  %p119_p7 = scmp.lt.s32.totalorder %s596_s15, 3 }
   0xa   : > { %p657_p6 = por %p112_p3, %p40_p0  ;;  %s598_s21 = smov [#allocation5]  }
   0xb   : > { %s859_s18 = scalar_select %p652_p4, 1, 0 }
   0xc   : > { %s860_s19 = scalar_select %p657_p6, 1, 0 }
   0xd   : > { %p662_p8 = pnand %p352_p5, %p119_p7  ;;  %s132_s22 = sshll.u32 %s598_s21, 4  ;;  %s133_s22 = int_to_ptr.vmem [resolvable:$true] %s132_s22 }
   0xe   : > { %s599_s23 = smov [#allocation7]   ;;  %s678_s26 = sadd.s32 1, %s596_s15  }
   0xf   : > { %s861_s20 = scalar_select %p662_p8, 1, 0 }
  0x10   : > { %p381_p10 = pneg %p662_p8  ;;  %s143_s24 = sshll.u32 %s599_s23, 4  ;;  %s675_s24 = int_to_ptr.vmem [resolvable:$true] %s143_s24 }
  0x11   : > { %s24_s27 = ssub.s32 %s596_s15, %s678_s26  ;;  %s440_s30 = scalar_lea.hbm %s853_s1, 16 }
  0x12   : > { %p671_p11 = pnand %p381_p10, %p856_p1  ;;  %p441_p12 = scmp.ne.s32.totalorder %s853_s1, %s440_s30 }
  0x13   : > { %p447_p5 = scmp.lt.u32.totalorder %s440_s30, %s853_s1 }
  0x14   : > { %p442_p13 = pneg %p671_p11 }
  0x16   : > { %p443_p0 = pnand %p442_p13, %p441_p12 }
  0x18   : > { %p444_p3 = pneg %p443_p0 }
  0x1a   : > { %p449_p7 = pnand %p447_p5, %p444_p3 }
  0x1c   : > { %452 = shalt.err (!%p449_p7)
}
  0x1d   : > { %s453_s8 = scalar_lea.vmem %s133_s22, 16  ;;  %s460_s9 = scalar_lea.vmem %s133_s22, 32 }
  0x1e   : > { %p454_p10 = scmp.ne.s32.totalorder %s133_s22, %s453_s8  ;;  %p461_p2 = scmp.lt.s32.totalorder %s133_s22, %s133_s22 }
  0x1f   : > { %p462_p6 = scmp.lt.s32.totalorder %s460_s9, %s453_s8 }
  0x20   : > { %p456_p9 = pnand %p454_p10, %p442_p13 }
  0x21   : > { %p463_p4 = por %p462_p6, %p461_p2 }
  0x22   : > { %p457_p1 = pneg %p456_p9 }
  0x24   : > { %p464_p8 = pnand %p463_p4, %p457_p1 }
  0x26   : > { %467 = shalt.err (!%p464_p8)
}
  0x27   : > { %384 = dma.hbm_to_vmem [thread:$0]  (!%p671_p11), %s853_s1, 16, %s133_s22, [#allocation6]  }
  0x28   : > { %s468_s23 = scalar_lea.hbm %s854_s2, 16 }
  0x29   : > { %p469_p9 = scmp.ne.s32.totalorder %s854_s2, %s468_s23  ;;  %p475_p4 = scmp.lt.u32.totalorder %s468_s23, %s854_s2 }
  0x2b   : > { %p471_p2 = pnand %p469_p9, %p442_p13 }
  0x2d   : > { %p472_p1 = pneg %p471_p2 }
  0x2f   : > { %p477_p6 = pnand %p475_p4, %p472_p1 }
  0x31   : > { %480 = shalt.err (!%p477_p6)
}
  0x32   : > { %s481_s22 = scalar_lea.vmem %s675_s24, 16  ;;  %s488_s5 = scalar_lea.vmem %s675_s24, 32 }
  0x33   : > { %p482_p8 = scmp.ne.s32.totalorder %s675_s24, %s481_s22  ;;  %p489_p3 = scmp.lt.s32.totalorder %s675_s24, %s675_s24 }
  0x34   : > { %p490_p5 = scmp.lt.s32.totalorder %s488_s5, %s481_s22 }
  0x35   : > { %p484_p12 = pnand %p482_p8, %p442_p13 }
  0x36   : > { %p491_p7 = por %p490_p5, %p489_p3 }
  0x37   : > { %p485_p0 = pneg %p484_p12 }
  0x39   : > { %p492_p10 = pnand %p491_p7, %p485_p0 }
  0x3b   : > { %495 = shalt.err (!%p492_p10)
}
  0x3c   : > { %387 = dma.hbm_to_vmem [thread:$0]  (!%p671_p11), %s854_s2, 16, %s675_s24, [#allocation6]  }
  0x3d   : > { %p25_p13 = scmp.eq.s32.totalorder %s24_s27, 0  ;;  %s27_s8 = sadd.s32 1, %s592_s14 }
  0x3e   : > { %p34_p9 = scmp.ne.s32.totalorder %s592_s14, %s588_s13  ;;  %p35_p2 = scmp.eq.s32.totalorder %s596_s15, 0 }
  0x3f   : > { %s738_s25 = scalar_select %p25_p13, %s592_s14, %s27_s8  }
  0x40   : > { %p36_p1 = por %p35_p2, %p34_p9  ;;  %p863_p4 = scmp.eq.s32.totalorder %s643_s16, 1 }
  0x41   : > { %p398_p8 = scmp.lt.s32.totalorder %s596_s15, 2  ;;  %s154_s10 = sand.u32 1, %s592_s14  }
  0x42   : > { %p742_p6 = por %p863_p4, %p34_p9  ;;  %s356_s11 = sshll.u32 %s154_s10, 3 }
  0x43   : > { %s357_s17 = sshll.u32 %s596_s15, 7  ;;  %s158_s27 = scalar_lea.vmem [#allocation2], %s356_s11 }
  0x44   : > { %s752_s24 = scalar_lea.hbm %s852_s0, %s357_s17  ;;  %s165_s28 = sshll.u32 %s158_s27, 4  ;;  %s754_s28 = int_to_ptr.vmem [resolvable:$true] %s165_s28 }
  0x45   : > { %p756_p11 = pnand %p398_p8, %p36_p1  ;;  %s155_s30 = scalar_lea.sflag [#allocation3], %s154_s10 }
  0x46   : > { %s496_s4 = scalar_lea.hbm %s752_s24, 128  ;;  %s501_s6 = scalar_lea.hbm %s852_s0, 256 }
  0x47   : > { %p497_p12 = scmp.ne.s32.totalorder %s752_s24, %s496_s4  ;;  %p498_p0 = pneg %p756_p11 }
  0x48   : > { %p502_p7 = scmp.lt.u32.totalorder %s752_s24, %s852_s0  ;;  %p503_p10 = scmp.lt.u32.totalorder %s501_s6, %s496_s4 }
  0x49   : > { %p499_p3 = pnand %p498_p0, %p497_p12  ;;  %p505_p9 = scmp.lt.u32.totalorder %s496_s4, %s752_s24 }
  0x4a   : > { %p504_p13 = por %p503_p10, %p502_p7 }
  0x4b   : > { %p500_p5 = pneg %p499_p3 }
  0x4c   : > { %p506_p2 = por %p505_p9, %p504_p13 }
  0x4e   : > { %p507_p1 = pnand %p506_p2, %p500_p5 }
  0x50   : > { %510 = shalt.err (!%p507_p1)
}
  0x51   : > { %s511_s10 = scalar_lea.vmem %s754_s28, 128  ;;  %s600_s11 = smov [#allocation2]  }
  0x52   : > { %p512_p4 = scmp.ne.s32.totalorder %s754_s28, %s511_s10  ;;  %s516_s17 = sshll.u32 %s600_s11, 4  ;;  %s517_s17 = int_to_ptr.vmem [resolvable:$false] %s516_s17 }
  0x53   : > { %s518_s21 = scalar_lea.vmem %s517_s17, 256  ;;  %p519_p3 = scmp.lt.s32.totalorder %s754_s28, %s517_s17 }
  0x54   : > { %p514_p8 = pnand %p512_p4, %p498_p0  ;;  %p520_p7 = scmp.lt.s32.totalorder %s518_s21, %s511_s10 }
  0x56   : > { %p515_p12 = pneg %p514_p8  ;;  %p521_p10 = por %p520_p7, %p519_p3 }
  0x58   : > { %p522_p13 = pnand %p521_p10, %p515_p12 }
  0x5a   : > { %525 = shalt.err (!%p522_p13)
}
  0x5b   : > { %391 = dma.hbm_to_vmem [thread:$0]  (!%p756_p11), %s752_s24, 128, %s754_s28, %s155_s30  }
  0x5c   : > { %p866_p5 = scmp.ne.s32.totalorder %s861_s20, 0 }
  0x5d   : > { %s788_s23 = sand.u32 (!%p866_p5), 1, %s588_s13   ;;  %p867_p0 = scmp.ne.s32.totalorder (!%p866_p5), %s859_s18, 0 }
  0x5e   : > { %174 = sbr.rel (%p866_p5) target bundleno = 446 (0x1be), region = 32  ;;  %s359_s27 = sshll.u32 (!%p866_p5), %s788_s23, 3 }
  0x5f   : > { %s177_s4 = scalar_lea.sflag (!%p866_p5), [#allocation3], %s788_s23  ;;  %s180_s22 = scalar_lea.vmem (!%p866_p5), [#allocation2], %s359_s27 }
  0x65   : > { %571 = dma.done.wait (%p867_p0), %s177_s4, 128  }
  0x66   : > { %573 = vsyncadd (%p867_p0), %s177_s4, 4294967168  ;;  %p868_p11 = scmp.eq.s32.totalorder %s643_s16, 0 }
  0x68   : > { %575 = dma.done.wait (%p868_p11), [#allocation6], 32   ;;  %p869_p9 = pmov %p868_p11 }
  0x69   : > { %v211_v0 = vld [vmem:[%s180_s22] sm:$0xff]  ;;  %v363_v14 = vld [vmem:[#allocation5] ss:$0 sm:$0xff]  ;;  %v364_v16 = vld [vmem:[#allocation7] ss:$0 sm:$0xff]  ;;  %s366_s18 = sshll.u32 %s643_s16, 7 }
  0x6a   : > { %577 = vsyncadd (%p869_p9), [#allocation6], 4294967264  ;;  %212 = vadd.xlane.f32.xlu0 %v211_v0  ;;  %s210_s20 = scalar_lea.vmem [#allocation8], %s359_s27  ;;  %s808_s30 = scalar_lea.hbm %s855_s3, %s366_s18 }
  0x6b   : > { %s262_s24 = sshll.u32 %s210_s20, 4  ;;  %s249_s5 = scalar_lea.sflag [#allocation4], %s788_s23  ;;  %s810_s24 = int_to_ptr.vmem [resolvable:$true] %s262_s24 }
  0x6c   : > { %s526_s6 = scalar_lea.vmem %s810_s24, 128  ;;  %s601_s16 = smov [#allocation8]  }
  0x6d   : > { %p527_p2 = scmp.ne.s32.totalorder %s810_s24, %s526_s6  ;;  %s530_s7 = sshll.u32 %s601_s16, 4  ;;  %s531_s7 = int_to_ptr.vmem [resolvable:$false] %s530_s7 }
  0x6e   : > { %s532_s8 = scalar_lea.vmem %s531_s7, 256  ;;  %p533_p8 = scmp.lt.s32.totalorder %s810_s24, %s531_s7 }
  0x6f   : > { %p528_p1 = pnand %p527_p2, %p742_p6  ;;  %p534_p12 = scmp.lt.s32.totalorder %s532_s8, %s526_s6 }
  0x71   : > { %p529_p4 = pneg %p528_p1  ;;  %p535_p3 = por %p534_p12, %p533_p8 }
  0x73   : > { %p536_p7 = pnand %p535_p3, %p529_p4 }
  0xf7   : > { %v213_v1 = vpop.xlane.xlu0 %212 }
  0xf8   : > { %v215_v2 = vmul.f32 0.0078125, %v213_v1 }
  0xfa   : > { %v216_v3 = vsub.f32 %v211_v0, %v215_v2 }
  0xfc   : > { %v217_v4 = vmul.f32 %v216_v3, %v216_v3 }
  0xfe   : > { %218 = vadd.xlane.f32.xlu0 %v217_v4 }
 0x18b   : > { %v219_v5 = vpop.xlane.xlu0 %218 }
 0x18c   : > { %v220_v6 = vmul.f32 0.007874016, %v219_v5 }
 0x18e   : > { %436 = vrsqrt.f32 %v220_v6  ;;  %vm223_vm0 = vcmp.eq.f32.partialorder %v220_v6, inf  ;;  %v226_v9 = vand.u32 2147483648, %v220_v6  ;;  %vm225_vm1 = vcmp.eq.f32.partialorder %v220_v6, 0.0 }
 0x198   : > { %v437_v7 = vpop.eup %436 }
 0x199   : > { %v222_v8 = vmul.f32 %v437_v7, %v220_v6 }
 0x19b   : > { %v224_v10 = vsel %vm223_vm0, %v220_v6, %v222_v8 }
 0x19c   : > { %v227_v11 = vsel %vm225_vm1, %v226_v9, %v224_v10 }
 0x19d   : > { %v228_v12 = vadd.f32 1e-06, %v227_v11 }
 0x19f   : > { %438 = vrcp.f32 %v228_v12 }
 0x1a9   : > { %v439_v13 = vpop.eup %438 }
 0x1aa   : > { %v230_v15 = vmul.f32 %v439_v13, %v216_v3 }
 0x1ac   : > { %v238_v17 = vmul.f32 %v363_v14, %v230_v15 }
 0x1ae   : > { %v246_v18 = vadd.f32 %v364_v16, %v238_v17 }
 0x1b0   : > { %247 = vst [vmem:[%s210_s20] sm:$0xff] %v246_v18 }
 0x1b1   : > { %539 = shalt.err (!%p536_p7)
}
 0x1b2   : > { %s540_s10 = scalar_lea.hbm %s808_s30, 128  ;;  %s544_s21 = scalar_lea.hbm %s855_s3, 256 }
 0x1b3   : > { %p541_p10 = scmp.ne.s32.totalorder %s808_s30, %s540_s10  ;;  %p545_p0 = scmp.lt.u32.totalorder %s808_s30, %s855_s3 }
 0x1b4   : > { %p546_p11 = scmp.lt.u32.totalorder %s544_s21, %s540_s10  ;;  %p548_p2 = scmp.lt.u32.totalorder %s540_s10, %s808_s30 }
 0x1b5   : > { %p542_p13 = pnand %p541_p10, %p742_p6 }
 0x1b6   : > { %p547_p9 = por %p546_p11, %p545_p0 }
 0x1b7   : > { %p543_p5 = pneg %p542_p13 }
 0x1b8   : > { %p549_p1 = por %p548_p2, %p547_p9 }
 0x1ba   : > { %p550_p4 = pnand %p549_p1, %p543_p5 }
 0x1bc   : > { %553 = shalt.err (!%p550_p4)
}
 0x1bd   : > { %379 = dma.vmem_to_hbm [thread:$0]  (%p742_p6), %s810_s24, 128, %s808_s30, %s249_s5  }
 0x1be PF: > { %s274_s4 = sand.u32 1, %s584_s12   ;;  %p870_p8 = scmp.ne.s32.totalorder %s860_s19, 0 }
 0x1bf   : > { %p871_p12 = scmp.ge.s32.totalorder %s596_s15, 2  ;;  %s275_s22 = scalar_lea.sflag [#allocation4], %s274_s4 }
 0x1c1   : > { %p393_p3 = pnand %p871_p12, %p870_p8 }
 0x1c3   : > { %579 = dma.done.wait (!%p393_p3), %s275_s22, 128  }
 0x1c4   : > { %581 = vsyncadd (!%p393_p3), %s275_s22, 4294967168  ;;  %p17_p7 = scmp.ge.s32.totalorder %s678_s26, 4   ;;  %s872_s12 = smov %s588_s13 }
 0x1c5   : > { %s873_s13 = smov %s592_s14  ;;  %s874_s14 = smov %s738_s25 }
 0x1c6   : > { %s875_s15 = smov %s678_s26  ;;  %19 = sbr.rel (!%p17_p7) target bundleno = 6 (0x6), region = 85 }
 0x1cd   :  { %280 = vsyncpa [#allocation3], 1 }
 0x1ce   :  { %282 = vsyncpa [#allocation3 + $0x1], 1 }
 0x1cf   :  { %283 = vsyncpa [#allocation6], 1 }
 0x1d0   :  { %284 = vsyncpa [#allocation4], 1 }
 0x1d1   :  { %286 = vsyncpa [#allocation4 + $0x1], 1 }

</bundles_post_ra>
